<compile_context>
chip_gen: v5e
topology: v5e:2x2
jax: 0.10.0
libtpu: 0.0.40
codegen_flags: <defaults>
</compile_context>

<pallas_src>
import jax
import jax.numpy as jnp
from jax.experimental import pallas as pl
from jax.experimental.pallas import tpu as pltpu


def _round_up(n, m):
    return ((n + m - 1) // m) * m


def _mlp_kernel(x_ref,
                w1_ref, b1_ref,
                w2_ref, b2_ref,
                w3_ref, b3_ref,
                w4_ref, b4_ref,
                out_ref):
    # x_ref is a (TB, 7) f32 tile; weights are resident bf16 blocks, biases f32.
    x = x_ref[...].astype(jnp.bfloat16)

    h = jnp.dot(x, w1_ref[...], preferred_element_type=jnp.float32) + b1_ref[...]
    h = jnp.maximum(h, 0.0).astype(jnp.bfloat16)

    h = jnp.dot(h, w2_ref[...], preferred_element_type=jnp.float32) + b2_ref[...]
    h = jnp.maximum(h, 0.0).astype(jnp.bfloat16)

    h = jnp.dot(h, w3_ref[...], preferred_element_type=jnp.float32) + b3_ref[...]
    h = jnp.maximum(h, 0.0).astype(jnp.bfloat16)

    out = jnp.dot(h, w4_ref[...], preferred_element_type=jnp.float32) + b4_ref[...]
    out_ref[...] = out.astype(out_ref.dtype)


def crop_prediction_model(x, params, *, block_b=4096):
    """Forward pass of CropPredictionModel.

    x: (B, 7) float32
    params: dict with w1..w4 as (in, out) and b1..b4 as (1, out) float32.
    Returns logits of shape (B, num_classes) in float32.
    """
    B, feat = x.shape
    num_classes = params["w4"].shape[1]

    # Weights in bf16 (cast once, ~25 KB total); biases stay f32 and are added
    # to the f32 accumulator.
    w1 = params["w1"].astype(jnp.bfloat16)
    w2 = params["w2"].astype(jnp.bfloat16)
    w3 = params["w3"].astype(jnp.bfloat16)
    w4 = params["w4"].astype(jnp.bfloat16)
    b1, b2, b3, b4 = params["b1"], params["b2"], params["b3"], params["b4"]
    d1, d2, d3 = w1.shape[1], w2.shape[1], w3.shape[1]

    # --- batch tile: multiple of 8; ensure >= 2 grid steps when possible so
    # the "parallel" batch axis can use both v7x TensorCores. No batch pad:
    # the ragged last block is handled by Pallas (OOB output rows dropped).
    tb = block_b
    if B <= 2 * block_b:
        tb = _round_up(max(pl.cdiv(B, 2), 1), 8)
    tb = min(tb, _round_up(B, 8))
    tb = max(tb, 8)
    grid = (pl.cdiv(B, tb),)

    # Resident (full-block, constant index) specs for weights/biases.
    def resident(shape):
        return pl.BlockSpec(shape, lambda i: (0, 0))

    flops = 2 * B * (feat * d1 + d1 * d2 + d2 * d3 + d3 * num_classes)
    bytes_accessed = (
        B * feat * 4                        # x (f32 in HBM)
        + B * num_classes * 4               # logits
        + (feat * d1 + d1 * d2 + d2 * d3 + d3 * num_classes) * 2   # bf16 weights
        + (d1 + d2 + d3 + num_classes) * 4  # f32 biases
    )

    out = pl.pallas_call(
        _mlp_kernel,
        out_shape=jax.ShapeDtypeStruct((B, num_classes), jnp.float32),
        grid=grid,
        in_specs=[
            pl.BlockSpec((tb, feat), lambda i: (i, 0)),   # x: batch-tiled
            resident((feat, d1)), resident((1, d1)),
            resident((d1, d2)), resident((1, d2)),
            resident((d2, d3)), resident((1, d3)),
            resident((d3, num_classes)), resident((1, num_classes)),
        ],
        out_specs=pl.BlockSpec((tb, num_classes), lambda i: (i, 0)),
        compiler_params=pltpu.CompilerParams(
            dimension_semantics=("parallel",)),
        cost_estimate=pl.CostEstimate(
            flops=flops, transcendentals=0, bytes_accessed=bytes_accessed),
    )(x, w1, b1, w2, b2, w3, b3, w4, b4)

    return out


def init_params(key, num_classes):
    """Deterministic init matching the nn.Linear shapes of CropPredictionModel.

    PyTorch nn.Linear stores weight as (out, in); here we store the transpose
    (in, out) so the kernel can use x @ W directly. Biases are (1, out) rows.
    """
    dims = [(7, 64), (64, 128), (128, 64), (64, num_classes)]
    params = {}
    for i, (din, dout) in enumerate(dims, start=1):
        key, kw, kb = jax.random.split(key, 3)
        bound = 1.0 / jnp.sqrt(float(din))  # PyTorch default uniform bound
        params[f"w{i}"] = jax.random.uniform(
            kw, (din, dout), jnp.float32, minval=-bound, maxval=bound)
        params[f"b{i}"] = jax.random.uniform(
            kb, (1, dout), jnp.float32, minval=-bound, maxval=bound)
    return params


def reference_forward(x, params):
    """Pure-JAX f32 reference for correctness checking."""
    h = jnp.maximum(x @ params["w1"] + params["b1"], 0.0)
    h = jnp.maximum(h @ params["w2"] + params["b2"], 0.0)
    h = jnp.maximum(h @ params["w3"] + params["b3"], 0.0)
    return h @ params["w4"] + params["b4"]


if __name__ == "__main__":
    key = jax.random.PRNGKey(0)
    num_classes = 10   # synthetic stand-in for len(label_encoder.classes_)

    kx, kx2, kp = jax.random.split(key, 3)
    params = init_params(kp, num_classes)

    # bf16 matmul inputs with f32 accumulation -> looser tolerance vs f32 ref.
    ATOL, RTOL = 3e-2, 3e-2

    # Small batch (single grid step).
    x_small = jax.random.normal(kx, (8, 7), jnp.float32)
    out_small = jax.block_until_ready(crop_prediction_model(x_small, params))
    ref_small = reference_forward(x_small, params)
    assert out_small.shape == (8, num_classes)
    assert jnp.allclose(out_small, ref_small, atol=ATOL, rtol=RTOL), \
        "small-batch mismatch vs reference"

    # Batch that exercises multiple grid steps + a ragged last block.
    x_big = jax.random.normal(kx2, (200, 7), jnp.float32)
    out_big = jax.block_until_ready(
        crop_prediction_model(x_big, params, block_b=64))
    ref_big = reference_forward(x_big, params)
    assert out_big.shape == (200, num_classes)
    assert jnp.allclose(out_big, ref_big, atol=ATOL, rtol=RTOL), \
        "tiled-batch mismatch vs reference"

    print("KERNEL_OK")
</pallas_src>

<mosaic_0001>
module attributes {stable_mosaic.version = 11 : i64} {
  func.func @_mlp_kernel(%arg0: i32, %arg1: memref<8x7xf32, #tpu.memory_space<vmem>>, %arg2: memref<7x64xbf16, #tpu.memory_space<vmem>>, %arg3: memref<1x64xf32, #tpu.memory_space<vmem>>, %arg4: memref<64x128xbf16, #tpu.memory_space<vmem>>, %arg5: memref<1x128xf32, #tpu.memory_space<vmem>>, %arg6: memref<128x64xbf16, #tpu.memory_space<vmem>>, %arg7: memref<1x64xf32, #tpu.memory_space<vmem>>, %arg8: memref<64x10xbf16, #tpu.memory_space<vmem>>, %arg9: memref<1x10xf32, #tpu.memory_space<vmem>>, %arg10: memref<8x10xf32, #tpu.memory_space<vmem>>) attributes {dimension_semantics = [#tpu.dimension_semantics<parallel>], iteration_bounds = array<i64: 1>, scalar_prefetch = 0 : i64, scratch_operands = 0 : i64, tpu.core_type = #tpu.core_type<tc>, window_params = [{transform_indices = @transform_0, window_bounds = array<i64: 8, 7>}, {pipeline_mode = #tpu.pipeline_mode<synchronous>, transform_indices = @transform_1, window_bounds = array<i64: 7, 64>}, {pipeline_mode = #tpu.pipeline_mode<synchronous>, transform_indices = @transform_2, window_bounds = array<i64: 1, 64>}, {pipeline_mode = #tpu.pipeline_mode<synchronous>, transform_indices = @transform_3, window_bounds = array<i64: 64, 128>}, {pipeline_mode = #tpu.pipeline_mode<synchronous>, transform_indices = @transform_4, window_bounds = array<i64: 1, 128>}, {pipeline_mode = #tpu.pipeline_mode<synchronous>, transform_indices = @transform_5, window_bounds = array<i64: 128, 64>}, {pipeline_mode = #tpu.pipeline_mode<synchronous>, transform_indices = @transform_6, window_bounds = array<i64: 1, 64>}, {pipeline_mode = #tpu.pipeline_mode<synchronous>, transform_indices = @transform_7, window_bounds = array<i64: 64, 10>}, {pipeline_mode = #tpu.pipeline_mode<synchronous>, transform_indices = @transform_8, window_bounds = array<i64: 1, 10>}, {transform_indices = @transform_9, window_bounds = array<i64: 8, 10>}]} {
    %c0 = arith.constant 0 : index
    %c0_0 = arith.constant 0 : index
    %0 = vector.load %arg1[%c0, %c0_0] : memref<8x7xf32, #tpu.memory_space<vmem>>, vector<8x7xf32>
    %1 = arith.truncf %0 : vector<8x7xf32> to vector<8x7xbf16>
    %c0_1 = arith.constant 0 : index
    %c0_2 = arith.constant 0 : index
    %2 = vector.load %arg2[%c0_1, %c0_2] : memref<7x64xbf16, #tpu.memory_space<vmem>>, vector<7x64xbf16>
    %cst = arith.constant dense<0.000000e+00> : vector<8x64xf32>
    %3 = tpu.matmul %1, %2, %cst {dimension_numbers = #tpu.dot_dimension_numbers<[1], [0], [0], [1], [0, 0, 1, 1], [], []>} : vector<8x7xbf16>, vector<7x64xbf16>, vector<8x64xf32> -> vector<8x64xf32>
    %c0_3 = arith.constant 0 : index
    %c0_4 = arith.constant 0 : index
    %4 = vector.load %arg3[%c0_3, %c0_4] : memref<1x64xf32, #tpu.memory_space<vmem>>, vector<1x64xf32>
    %5 = vector.broadcast %4 : vector<1x64xf32> to vector<8x64xf32>
    %6 = arith.addf %3, %5 : vector<8x64xf32>
    %cst_5 = arith.constant 0.000000e+00 : f32
    %7 = vector.broadcast %cst_5 : f32 to vector<8x64xf32>
    %8 = arith.maximumf %6, %7 : vector<8x64xf32>
    %9 = arith.truncf %8 : vector<8x64xf32> to vector<8x64xbf16>
    %c0_6 = arith.constant 0 : index
    %c0_7 = arith.constant 0 : index
    %10 = vector.load %arg4[%c0_6, %c0_7] : memref<64x128xbf16, #tpu.memory_space<vmem>>, vector<64x128xbf16>
    %cst_8 = arith.constant dense<0.000000e+00> : vector<8x128xf32>
    %11 = tpu.matmul %9, %10, %cst_8 {dimension_numbers = #tpu.dot_dimension_numbers<[1], [0], [0], [1], [0, 0, 1, 1], [], []>} : vector<8x64xbf16>, vector<64x128xbf16>, vector<8x128xf32> -> vector<8x128xf32>
    %c0_9 = arith.constant 0 : index
    %c0_10 = arith.constant 0 : index
    %12 = vector.load %arg5[%c0_9, %c0_10] : memref<1x128xf32, #tpu.memory_space<vmem>>, vector<1x128xf32>
    %13 = vector.broadcast %12 : vector<1x128xf32> to vector<8x128xf32>
    %14 = arith.addf %11, %13 : vector<8x128xf32>
    %cst_11 = arith.constant 0.000000e+00 : f32
    %15 = vector.broadcast %cst_11 : f32 to vector<8x128xf32>
    %16 = arith.maximumf %14, %15 : vector<8x128xf32>
    %17 = arith.truncf %16 : vector<8x128xf32> to vector<8x128xbf16>
    %c0_12 = arith.constant 0 : index
    %c0_13 = arith.constant 0 : index
    %18 = vector.load %arg6[%c0_12, %c0_13] : memref<128x64xbf16, #tpu.memory_space<vmem>>, vector<128x64xbf16>
    %cst_14 = arith.constant dense<0.000000e+00> : vector<8x64xf32>
    %19 = tpu.matmul %17, %18, %cst_14 {dimension_numbers = #tpu.dot_dimension_numbers<[1], [0], [0], [1], [0, 0, 1, 1], [], []>} : vector<8x128xbf16>, vector<128x64xbf16>, vector<8x64xf32> -> vector<8x64xf32>
    %c0_15 = arith.constant 0 : index
    %c0_16 = arith.constant 0 : index
    %20 = vector.load %arg7[%c0_15, %c0_16] : memref<1x64xf32, #tpu.memory_space<vmem>>, vector<1x64xf32>
    %21 = vector.broadcast %20 : vector<1x64xf32> to vector<8x64xf32>
    %22 = arith.addf %19, %21 : vector<8x64xf32>
    %cst_17 = arith.constant 0.000000e+00 : f32
    %23 = vector.broadcast %cst_17 : f32 to vector<8x64xf32>
    %24 = arith.maximumf %22, %23 : vector<8x64xf32>
    %25 = arith.truncf %24 : vector<8x64xf32> to vector<8x64xbf16>
    %c0_18 = arith.constant 0 : index
    %c0_19 = arith.constant 0 : index
    %26 = vector.load %arg8[%c0_18, %c0_19] : memref<64x10xbf16, #tpu.memory_space<vmem>>, vector<64x10xbf16>
    %cst_20 = arith.constant dense<0.000000e+00> : vector<8x10xf32>
    %27 = tpu.matmul %25, %26, %cst_20 {dimension_numbers = #tpu.dot_dimension_numbers<[1], [0], [0], [1], [0, 0, 1, 1], [], []>} : vector<8x64xbf16>, vector<64x10xbf16>, vector<8x10xf32> -> vector<8x10xf32>
    %c0_21 = arith.constant 0 : index
    %c0_22 = arith.constant 0 : index
    %28 = vector.load %arg9[%c0_21, %c0_22] : memref<1x10xf32, #tpu.memory_space<vmem>>, vector<1x10xf32>
    %29 = vector.broadcast %28 : vector<1x10xf32> to vector<8x10xf32>
    %30 = arith.addf %27, %29 : vector<8x10xf32>
    %c0_23 = arith.constant 0 : index
    %c0_24 = arith.constant 0 : index
    %31 = vector.load %arg10[%c0_23, %c0_24] : memref<8x10xf32, #tpu.memory_space<vmem>>, vector<8x10xf32>
    tpu.vector_store %arg10[%c0_23, %c0_24], %30 {strides = array<i32>} : memref<8x10xf32, #tpu.memory_space<vmem>>, vector<8x10xf32>,
    return
  }
  func.func @transform_0(%arg0: i32) -> (i32, i32) {
    %c0_i32 = arith.constant 0 : i32
    %c0_i32_0 = arith.constant 0 : i32
    return %arg0, %c0_i32 : i32, i32
  }
  func.func @transform_1(%arg0: i32) -> (i32, i32) {
    %c0_i32 = arith.constant 0 : i32
    %c0_i32_0 = arith.constant 0 : i32
    %c0_i32_1 = arith.constant 0 : i32
    return %c0_i32, %c0_i32_0 : i32, i32
  }
  func.func @transform_2(%arg0: i32) -> (i32, i32) {
    %c0_i32 = arith.constant 0 : i32
    %c0_i32_0 = arith.constant 0 : i32
    %c0_i32_1 = arith.constant 0 : i32
    return %c0_i32, %c0_i32_0 : i32, i32
  }
  func.func @transform_3(%arg0: i32) -> (i32, i32) {
    %c0_i32 = arith.constant 0 : i32
    %c0_i32_0 = arith.constant 0 : i32
    %c0_i32_1 = arith.constant 0 : i32
    return %c0_i32, %c0_i32_0 : i32, i32
  }
  func.func @transform_4(%arg0: i32) -> (i32, i32) {
    %c0_i32 = arith.constant 0 : i32
    %c0_i32_0 = arith.constant 0 : i32
    %c0_i32_1 = arith.constant 0 : i32
    return %c0_i32, %c0_i32_0 : i32, i32
  }
  func.func @transform_5(%arg0: i32) -> (i32, i32) {
    %c0_i32 = arith.constant 0 : i32
    %c0_i32_0 = arith.constant 0 : i32
    %c0_i32_1 = arith.constant 0 : i32
    return %c0_i32, %c0_i32_0 : i32, i32
  }
  func.func @transform_6(%arg0: i32) -> (i32, i32) {
    %c0_i32 = arith.constant 0 : i32
    %c0_i32_0 = arith.constant 0 : i32
    %c0_i32_1 = arith.constant 0 : i32
    return %c0_i32, %c0_i32_0 : i32, i32
  }
  func.func @transform_7(%arg0: i32) -> (i32, i32) {
    %c0_i32 = arith.constant 0 : i32
    %c0_i32_0 = arith.constant 0 : i32
    %c0_i32_1 = arith.constant 0 : i32
    return %c0_i32, %c0_i32_0 : i32, i32
  }
  func.func @transform_8(%arg0: i32) -> (i32, i32) {
    %c0_i32 = arith.constant 0 : i32
    %c0_i32_0 = arith.constant 0 : i32
    %c0_i32_1 = arith.constant 0 : i32
    return %c0_i32, %c0_i32_0 : i32, i32
  }
  func.func @transform_9(%arg0: i32) -> (i32, i32) {
    %c0_i32 = arith.constant 0 : i32
    %c0_i32_0 = arith.constant 0 : i32
    return %arg0, %c0_i32 : i32, i32
  }
}

</mosaic_0001>

<bundles_post_ra>
// kernel: tpu_custom_call.1
= control target key start
LH: loop header
LB: loop body
LE: loop exit
PB: predicated region body
PF: predicated region fallthrough
CT: control target
= control target key end

     0   :  { %vm45_vm0 = vcmask 1042432   ;;  %vm46_vm1 = vcmask 1043456   ;;  %v390_v1 = vmov 65535   ;;  %s513_s0 = inlined_call_operand.vmem [shape: f32[8,7], index: 0, kind: input, shape index: {}]   ;;  %s514_s1 = inlined_call_operand.vmem [shape: bf16[7,64], index: 1, kind: input, shape index: {}]   ;;  %s515_s2 = inlined_call_operand.vmem [shape: f32[1,64], index: 2, kind: input, shape index: {}]   ;;  %s516_s3 = inlined_call_operand.vmem [shape: bf16[64,128], index: 3, kind: input, shape index: {}]   ;;  %s517_s4 = inlined_call_operand.vmem [shape: f32[1,128], index: 4, kind: input, shape index: {}]   ;;  %s518_s5 = inlined_call_operand.vmem [shape: bf16[128,64], index: 5, kind: input, shape index: {}]   ;;  %s519_s6 = inlined_call_operand.vmem [shape: f32[1,64], index: 6, kind: input, shape index: {}]   ;;  %s520_s7 = inlined_call_operand.vmem [shape: bf16[64,10], index: 7, kind: input, shape index: {}]   ;;  %s521_s8 = inlined_call_operand.vmem [shape: f32[1,10], index: 8, kind: input, shape index: {}]   ;;  %s522_s9 = inlined_call_operand.hbm [shape: f32[8,10], index: 9, kind: output, shape index: {}]  }
   0x1   :  { %v36_v0 = vld [vmem:[%s514_s1] sm:$0xf]  ;;  %v47_v2 = vsel %vm45_vm0, 4294967295, %v390_v1  ;;  %v345_v4 = vld [vmem:[%s516_s3 + $0x18] sm:$0xff]  ;;  %v344_v6 = vld [vmem:[%s516_s3 + $0x10] sm:$0xff] }
   0x2   :  { %v34_v3 = vld [vmem:[%s513_s0] sm:$0xff]  ;;  %v48_v5 = vsel %vm46_vm1, %v47_v2, 0  ;;  %111 = vmatpush.bf16.msra.mxu1 %v345_v4 }
   0x3   :  { %v50_v7 = vand.u32 %v48_v5, %v36_v0 }
   0x4   :  { %14 = vsyncpa [#allocation3], 0  ;;  %v35_v8 = vpack.c.bf16 %v34_v3, %v34_v3  ;;  %vm41_vm2 = vcmask 56320   ;;  %v343_v9 = vld [vmem:[%s516_s3 + $0x8] sm:$0xff]  ;;  %v342_v10 = vld [vmem:[%s516_s3] sm:$0xff]  ;;  %vm103_vm3 = vcmask 523264  }
   0x5   :  { %59 = vmatpush.bf16.msra.mxu0 %v50_v7  ;;  %v353_v11 = vld [vmem:[%s518_s5 + $0x38] sm:$0xff]  ;;  %v352_v12 = vld [vmem:[%s518_s5 + $0x30] sm:$0xff]  ;;  %v351_v13 = vld [vmem:[%s518_s5 + $0x28] sm:$0xff]  ;;  %s391_s24 = smov [#allocation2]   ;;  %s266_s3 = sshll.u32 %s522_s9, 4  ;;  %vm257_vm4 = vcmask 80896   ;;  %s267_s3 = int_to_ptr.hbm [resolvable:$true] %s266_s3 }
   0x6   :  { %112 = vmatpush.bf16.msra.mxu1 %v344_v6  ;;  %190 = vmatpush.bf16.msra.mxu2 %v353_v11  ;;  %v350_v14 = vld [vmem:[%s518_s5 + $0x20] sm:$0xff]  ;;  %v349_v15 = vld [vmem:[%s518_s5 + $0x18] sm:$0xff]  ;;  %v348_v16 = vld [vmem:[%s518_s5 + $0x10] sm:$0xff]  ;;  %s264_s25 = sshll.u32 %s391_s24, 4  ;;  %s265_s25 = int_to_ptr.vmem [resolvable:$true] %s264_s25 }
   0x7   :  { %v360_v17 = vld [vmem:[%s515_s2] ss:$0 sm:$0xff]  ;;  %v347_v23 = vld [vmem:[%s518_s5 + $0x8] sm:$0xff]  ;;  %v357_v25 = vld [vmem:[%s520_s7 + $0x18] sm:$0xff] }
   0x8   :  { %275 = vmatmul.msk.bf16.vlgmr.msra.gmra.mxu0 %vm41_vm2, %v35_v8  ;;  %v346_v24 = vld [vmem:[%s518_s5] sm:$0xff]  ;;  %248 = vmatpush.bf16.msra.mxu3 %v357_v25  ;;  %v356_v26 = vld [vmem:[%s520_s7 + $0x10] sm:$0xff]  ;;  %v355_v33 = vld [vmem:[%s520_s7 + $0x8] sm:$0xff] }
   0x9   :  { %v361_v27 = vld [vmem:[%s517_s4] ss:$0 sm:$0xff] }
   0xa   :  { %113 = vmatpush.bf16.msra.mxu1 %v343_v9  ;;  %191 = vmatpush.bf16.msra.mxu2 %v352_v12  ;;  %v354_v34 = vld [vmem:[%s520_s7] sm:$0xff] }
   0xb   :  { %v362_v35 = vld [vmem:[%s519_s6] ss:$0 sm:$0xff] }
   0xc   :  { %249 = vmatpush.bf16.msra.mxu3 %v356_v26  ;;  %v363_v41 = vld [vmem:[%s521_s8] ss:$0 sm:$0xff] }
   0xe   :  { %114 = vmatpush.bf16.msra.mxu1 %v342_v10  ;;  %192 = vmatpush.bf16.msra.mxu2 %v351_v13 }
  0x10   :  { %250 = vmatpush.bf16.msra.mxu3 %v355_v33 }
  0x12   :  { %193 = vmatpush.bf16.msra.mxu2 %v350_v14 }
  0x14   :  { %251 = vmatpush.bf16.msra.mxu3 %v354_v34 }
  0x16   :  { %194 = vmatpush.bf16.msra.mxu2 %v349_v15 }
  0x1a   :  { %195 = vmatpush.bf16.msra.mxu2 %v348_v16 }
  0x1e   :  { %196 = vmatpush.bf16.msra.mxu2 %v347_v23 }
  0x22   :  { %197 = vmatpush.bf16.msra.mxu2 %v346_v24 }
  0x85   :  { %v61_v18 = vpop.f32.mrf.mxu0 }
  0x86   :  { %v62_v19 = vadd.f32 %v360_v17, %v61_v18 }
  0x88   :  { %v65_v20 = vmax.f32 %v62_v19, 0.0 }
  0x8a   :  { %v66_v21 = vpack.c.bf16 %v65_v20, %v65_v20 }
  0x8c   :  { %292 = vmatmul.msk.bf16.vlgmr.msra.gmra.mxu1 %vm103_vm3, %v66_v21 }
  0x8d   :  { %v63_v22 = vpop.f32.mrf.mxu0 }
 0x109   :  { %v116_v28 = vpop.f32.mrf.mxu1 }
 0x10a   :  { %v117_v29 = vadd.f32 %v361_v27, %v116_v28 }
 0x10c   :  { %v120_v30 = vmax.f32 %v117_v29, 0.0 }
 0x10e   :  { %v121_v31 = vpack.c.bf16 %v120_v30, %v120_v30 }
 0x110   :  { %198 = vmatmul.bf16.vlgmr.msra.gmra.mxu2 %v121_v31 }
 0x111   :  { %v118_v32 = vpop.f32.mrf.mxu1 }
 0x193   :  { %v199_v36 = vpop.f32.mrf.mxu2 }
 0x194   :  { %v200_v37 = vadd.f32 %v362_v35, %v199_v36 }
 0x196   :  { %v203_v38 = vmax.f32 %v200_v37, 0.0 }
 0x198   :  { %v204_v39 = vpack.c.bf16 %v203_v38, %v203_v38 }
 0x19a   :  { %341 = vmatmul.msk.bf16.vlgmr.msra.gmra.mxu3 %vm103_vm3, %v204_v39 }
 0x19b   :  { %v201_v40 = vpop.f32.mrf.mxu2 }
 0x21d   :  { %v253_v42 = vpop.f32.mrf.mxu3 }
 0x21e   :  { %v254_v43 = vadd.f32 %v363_v41, %v253_v42 }
 0x220   :  { %258 = vst.msk [vmem:[#allocation2] sm:$0xff] %vm257_vm4, %v254_v43 }
 0x221   :  { %269 = dma.vmem_to_hbm [thread:$0]  %s265_s25, 128, %s267_s3, [#allocation3]  }
 0x225   :  { %v255_v44 = vpop.f32.mrf.mxu3 }
 0x226   :  { %388 = dma.done.wait [#allocation3], 128  }
 0x227   :  { %389 = vsyncadd [#allocation3], 4294967168 }
 0x228   :  { %274 = vsyncpa [#allocation3], 1 }

</bundles_post_ra>
